<compile_context>
chip_gen: v7x
topology: tpu7x:2x2x1
jax: 0.10.0
libtpu: 0.0.40
codegen_flags: <defaults>
</compile_context>

<pallas_src>
import math

import jax
import jax.numpy as jnp
from jax.experimental import pallas as pl
from jax.experimental.pallas import tpu as pltpu


# ---------------------------------------------------------------------------
# helpers
# ---------------------------------------------------------------------------
def _round_up(x, m):
    return ((x + m - 1) // m) * m


def _vmem_limit_bytes():
    # 128 MiB physical VMEM on v5e/v6e, 64 MiB on v7x; leave headroom.
    try:
        cap = int(pltpu.get_tpu_info().vmem_capacity_bytes)
    except Exception:
        cap = 64 << 20  # conservative fallback (v7x)
    return int(min(cap * 3 // 4, 96 << 20))


def _transcendental_dtype():
    # bf16 tanh on v6e/v7x (bf16 EUP ~2x transcendental throughput); f32 on
    # v5e which has no bf16 EUP.
    try:
        name = str(getattr(pltpu.get_tpu_info(), "chip_version", "")).lower()
        if "v5" in name:
            return jnp.float32
    except Exception:
        pass
    return jnp.bfloat16


_TANH_DTYPE = _transcendental_dtype()


def _row_block(rows, bytes_per_row, vmem_budget, fixed_bytes=0,
               cap=512, min_steps=4, quantum=8):
    """Row-tile size. `bytes_per_row` must include double-buffered DMA blocks
    AND in-kernel intermediates. Capped so the grid keeps >= min_steps
    iterations (DMA/compute overlap, v7x megacore sharding) and <= `cap` rows
    (~512-row tiles already reach ~85% of HBM roofline)."""
    budget = max(vmem_budget // 2 - fixed_bytes, 1 << 20)
    m = budget // max(bytes_per_row, 1)
    target = _round_up(max(-(-rows // min_steps), quantum), quantum)
    m = min(m, cap, target)
    return max(quantum, (m // quantum) * quantum)


# ---------------------------------------------------------------------------
# Kernel 1: additive-attention pooling over token embeddings (TitleEncoder).
#   x : (M_BLK, T, H) bf16   w1 : (H, H) bf16   b1,q : (1, H) f32
#   out[m] = sum_t softmax_t( q . tanh(W1 x[m,t] + b1) ) * x[m,t]   (bf16 out)
# ---------------------------------------------------------------------------
def _title_pool_kernel(x_ref, w1_ref, b1_ref, q_ref, out_ref):
    x = x_ref[...]                                        # (Mb, T, H) bf16
    Mb, T, H = x.shape
    # W1 projection on the MXU (bf16 operands, f32 accumulation).
    h = jnp.dot(x.reshape(Mb * T, H), w1_ref[...],
                preferred_element_type=jnp.float32)
    h = jnp.tanh((h + b1_ref[...]).astype(_TANH_DTYPE))   # EUP (bf16 on v6e/v7x)
    h = h.reshape(Mb, T, H)
    # Query projection: VPU broadcast-mul + lane reduce (no N=1 MXU matmul).
    g = jnp.sum(h * q_ref[...].reshape(1, 1, H), axis=-1)            # (Mb, T) f32
    g = g - jnp.max(g, axis=-1, keepdims=True)
    e = jnp.exp(g)
    attn = e * pl.reciprocal(jnp.sum(e, axis=-1, keepdims=True), approx=True)
    # Weighted pooling: bf16 multiply (no full f32 copy of x), f32 accumulate.
    pooled = jnp.sum(x * attn[:, :, None].astype(jnp.bfloat16),
                     axis=1, dtype=jnp.float32)                       # (Mb, H)
    out_ref[...] = pooled.astype(jnp.bfloat16)


def additive_attend_pool(x_bf16, w1, b1, q_row):
    """x: (M, T, H) bf16 token embeddings -> (M, H) bf16 pooled vectors."""
    M, T, H = x_bf16.shape
    vmem = _vmem_limit_bytes()
    bytes_per_row = (2 * (T * H * 2)            # double-buffered bf16 input
                     + 2 * (H * 2)              # double-buffered bf16 output
                     + T * H * (4 + 2 + 2 + 4)  # f32 proj, tanh, weighted, cvt
                     + 16 * T * 4)              # attention-score temporaries
    fixed = 2 * (H * H * 2 + 2 * H * 4) + (1 << 20)
    m_blk = _row_block(M, bytes_per_row, vmem, fixed_bytes=fixed, quantum=16)
    Mp = _round_up(M, m_blk)
    if Mp != M:
        x_bf16 = jnp.pad(x_bf16, ((0, Mp - M), (0, 0), (0, 0)))
    out = pl.pallas_call(
        _title_pool_kernel,
        out_shape=jax.ShapeDtypeStruct((Mp, H), jnp.bfloat16),
        grid_spec=pltpu.PrefetchScalarGridSpec(
            num_scalar_prefetch=0,
            grid=(Mp // m_blk,),
            in_specs=[
                pl.BlockSpec((m_blk, T, H), lambda i: (i, 0, 0)),
                pl.BlockSpec((H, H), lambda i: (0, 0)),
                pl.BlockSpec((1, H), lambda i: (0, 0)),
                pl.BlockSpec((1, H), lambda i: (0, 0)),
            ],
            out_specs=pl.BlockSpec((m_blk, H), lambda i: (i, 0)),
        ),
        compiler_params=pltpu.CompilerParams(
            dimension_semantics=("parallel",),
            vmem_limit_bytes=vmem),
    )(x_bf16, w1.astype(jnp.bfloat16), b1, q_row)
    return out[:M]


# ---------------------------------------------------------------------------
# Kernel 2: fused user/score head.
#   title_v = SelfAttend(pos_his)            (additive attention, sa_*)
#   pos_s   = NodesEncoder(pos_his)          (additive attention, ne_*)
#   gamma   = Linear(H,1)(tanh([title_v ; target] W1 + b1)) + b2
#   score   = gamma * (pos_s . target)   ==  sum_h(gamma * pos_s * target)
# Both attends share ONE (H, 2H) MXU matmul; query rows are zero-padded to
# (1, 2H) so no lane slicing is needed. Output is a lane-dense (B_BLK, 128)
# slab; wrapper slices [:, :N].
# ---------------------------------------------------------------------------
def _user_score_kernel(his_ref, tgt_ref,
                       attn_w1_ref, attn_b1_ref, sa_q_ref, ne_q_ref,
                       w1a_ref, w1b_ref, b1_ref, w2_ref, b2_ref,
                       out_ref):
    his = his_ref[...]                                    # (Bb, L, H) bf16
    tgt = tgt_ref[...]                                    # (Bb, N, H) bf16
    Bb, L, H = his.shape
    N = tgt.shape[1]
    NPAD = out_ref.shape[1]

    # One wide MXU matmul feeds BOTH additive attends ([sa | ne] on lanes).
    h = jnp.dot(his.reshape(Bb * L, H), attn_w1_ref[...],
                preferred_element_type=jnp.float32)                  # (Bb*L, 2H)
    h = jnp.tanh((h + attn_b1_ref[...]).astype(_TANH_DTYPE))
    h = h.reshape(Bb, L, 2 * H)

    def pool(q_row):
        # q_row is zero-padded to (1, 2H): the "other" half contributes 0.
        g = jnp.sum(h * q_row.reshape(1, 1, 2 * H), axis=-1)         # (Bb, L) f32
        g = g - jnp.max(g, axis=-1, keepdims=True)
        e = jnp.exp(g)
        a = e * pl.reciprocal(jnp.sum(e, axis=-1, keepdims=True), approx=True)
        return jnp.sum(his * a[:, :, None].astype(jnp.bfloat16),
                       axis=1, dtype=jnp.float32)                    # (Bb, H)

    title_v = pool(sa_q_ref[...])        # title_self_attend
    pos_s = pool(ne_q_ref[...])          # news_encoder

    # policy_pos_s: Linear(2H -> H) with the weight split into the title_v half
    # (w1a) and the target half (w1b) so cat([title_v, target], -1) never
    # materializes; then Tanh; then Linear(H -> 1) as a VPU reduce.
    tv_proj = jnp.dot(title_v.astype(jnp.bfloat16), w1a_ref[...],
                      preferred_element_type=jnp.float32)            # (Bb, H)
    tg_proj = jnp.dot(tgt.reshape(Bb * N, H), w1b_ref[...],
                      preferred_element_type=jnp.float32).reshape(Bb, N, H)
    hid = jnp.tanh(
        (tg_proj + tv_proj[:, None, :] + b1_ref[...]).astype(_TANH_DTYPE))
    gamma = jnp.sum(hid * w2_ref[...].reshape(1, 1, H), axis=-1) + b2_ref[0, 0]

    # score = sum_h(gamma * pos_s * target) = gamma * (pos_s . target)
    dot_ps = jnp.sum(pos_s[:, None, :] * tgt, axis=-1)               # (Bb, N) f32
    score = gamma * dot_ps
    # Lane-dense store: pad the candidate axis up to NPAD lanes.
    out_ref[...] = jnp.concatenate(
        [score, jnp.zeros((Bb, NPAD - N), jnp.float32)], axis=-1)


def pnrec_user_score(pos_his, target, p):
    B, L, H = pos_his.shape
    N = target.shape[1]
    NPAD = _round_up(max(N, 128), 128)
    vmem = _vmem_limit_bytes()
    bytes_per_row = (2 * (L * H * 2 + N * H * 2 + NPAD * 4)   # dbl-buffered blocks
                     + L * 2 * H * (4 + 2)                    # attend proj f32+tanh
                     + 2 * L * H * (2 + 4)                    # two weighted sums
                     + N * H * (4 + 2 + 4)                    # tg_proj, hid, dot tmp
                     + 16 * (L + N) * 4)
    fixed = 2 * (2 * H * H * 2 + 2 * H * H * 2 + 8 * H * 4) + (1 << 20)
    b_blk = _row_block(B, bytes_per_row, vmem, fixed_bytes=fixed, quantum=8)
    Bp = _round_up(B, b_blk)
    if Bp != B:
        pad = ((0, Bp - B), (0, 0), (0, 0))
        pos_his = jnp.pad(pos_his, pad)
        target = jnp.pad(target, pad)
    bf = jnp.bfloat16
    zeros_h = jnp.zeros((1, H), jnp.float32)
    attn_w1 = jnp.concatenate([p["sa_w1"], p["ne_w1"]], axis=1).astype(bf)  # (H,2H)
    attn_b1 = jnp.concatenate([p["sa_b1"], p["ne_b1"]], axis=1)             # (1,2H)
    sa_q = jnp.concatenate([p["sa_q"], zeros_h], axis=1)                    # (1,2H)
    ne_q = jnp.concatenate([zeros_h, p["ne_q"]], axis=1)                    # (1,2H)
    out = pl.pallas_call(
        _user_score_kernel,
        out_shape=jax.ShapeDtypeStruct((Bp, NPAD), jnp.float32),
        grid_spec=pltpu.PrefetchScalarGridSpec(
            num_scalar_prefetch=0,
            grid=(Bp // b_blk,),
            in_specs=[
                pl.BlockSpec((b_blk, L, H), lambda i: (i, 0, 0)),   # pos_his
                pl.BlockSpec((b_blk, N, H), lambda i: (i, 0, 0)),   # target
                pl.BlockSpec((H, 2 * H), lambda i: (0, 0)),         # attn_w1
                pl.BlockSpec((1, 2 * H), lambda i: (0, 0)),         # attn_b1
                pl.BlockSpec((1, 2 * H), lambda i: (0, 0)),         # sa_q (padded)
                pl.BlockSpec((1, 2 * H), lambda i: (0, 0)),         # ne_q (padded)
                pl.BlockSpec((H, H), lambda i: (0, 0)),             # pp_w1a
                pl.BlockSpec((H, H), lambda i: (0, 0)),             # pp_w1b
                pl.BlockSpec((1, H), lambda i: (0, 0)),             # pp_b1
                pl.BlockSpec((1, H), lambda i: (0, 0)),             # pp_w2
                pl.BlockSpec(memory_space=pltpu.MemorySpace.SMEM),  # pp_b2 scalar
            ],
            out_specs=pl.BlockSpec((b_blk, NPAD), lambda i: (i, 0)),
        ),
        compiler_params=pltpu.CompilerParams(
            dimension_semantics=("parallel",),
            vmem_limit_bytes=vmem),
    )(pos_his, target, attn_w1, attn_b1, sa_q, ne_q,
      p["pp_w1a"].astype(bf), p["pp_w1b"].astype(bf), p["pp_b1"],
      p["pp_w2"], p["pp_b2"])
    return out[:B, :N]


# ---------------------------------------------------------------------------
# Parameter construction (deterministic, PyTorch-Linear-style fan-in init).
# ---------------------------------------------------------------------------
def init_params(key, cfg):
    H = cfg["hidden_size"]

    def lin(k, fan_in, shape):
        bound = 1.0 / math.sqrt(fan_in)
        return jax.random.uniform(k, shape, jnp.float32, -bound, bound)

    ks = jax.random.split(key, 16)
    params = {
        # word embedding used by the (assumed) TitleEncoder — stored bf16 so the
        # gathered (rows, T, H) activations cost half the HBM bytes.
        "word_emb": (jax.random.normal(ks[0], (cfg["vocab_size"], H), jnp.float32)
                     * 0.1).astype(jnp.bfloat16),
        # title encoder additive attention
        "te_w1": lin(ks[1], H, (H, H)), "te_b1": lin(ks[2], H, (1, H)),
        "te_q":  lin(ks[3], H, (1, H)),
        # title_self_attend (SelfAttend(hidden_size))
        "sa_w1": lin(ks[4], H, (H, H)), "sa_b1": lin(ks[5], H, (1, H)),
        "sa_q":  lin(ks[6], H, (1, H)),
        # news_encoder (NodesEncoder) history pooling
        "ne_w1": lin(ks[7], H, (H, H)), "ne_b1": lin(ks[8], H, (1, H)),
        "ne_q":  lin(ks[9], H, (1, H)),
        # policy_pos_s: Linear(2H, H) split into title_v / target halves
        "pp_w1a": lin(ks[10], 2 * H, (H, H)),
        "pp_w1b": lin(ks[11], 2 * H, (H, H)),
        "pp_b1":  lin(ks[12], 2 * H, (1, H)),
        "pp_w2":  lin(ks[13], H, (1, H)),
        "pp_b2":  lin(ks[14], H, (1, 1)),
        # news_embedding exists in __init__ but is unused in forward()
        "news_embedding": jax.random.normal(
            ks[15], (cfg["tracks_num"], H), jnp.float32) * 0.1,
    }
    return params


# ---------------------------------------------------------------------------
# PNRec.forward
# ---------------------------------------------------------------------------
def pnrec_forward(params, data, cfg, test_mode=False):
    H = cfg["hidden_size"]
    T = cfg["max_lyric_len"]
    L = cfg["pos_hist_length"]
    neg_num = 0 if test_mode else cfg["neg_count"]
    N = neg_num + 1

    # --- TitleEncoder.encode_news on candidates AND history, one pooling call.
    tgt_tok = data[3].reshape(-1, T)                                  # (B*N, T)
    his_tok = data[4].reshape(-1, T)                                  # (B*L, T)
    n_tgt = tgt_tok.shape[0]
    all_tok = jnp.concatenate([tgt_tok, his_tok], axis=0)
    # TODO(synk): the embedding gather is still a separate XLA op; fusing it
    # into the pooling kernel (token ids scalar-prefetched to SMEM + per-row
    # DMA gather from an HBM-resident table via memory_space=pl.ANY) would
    # remove one full HBM pass of the (rows, T, H) activations at prod sizes.
    all_emb = jnp.take(params["word_emb"], all_tok, axis=0)           # bf16
    pooled = additive_attend_pool(
        all_emb, params["te_w1"], params["te_b1"], params["te_q"])    # bf16

    target_news = pooled[:n_tgt].reshape(-1, N, H)                    # (B, N, H)
    pos_his = pooled[n_tgt:].reshape(-1, L, H)                        # (B, L, H)

    # --- fused title_self_attend + news_encoder + policy gate + score ------
    return pnrec_user_score(pos_his, target_news, params)             # (B, N)


# ---------------------------------------------------------------------------
if __name__ == "__main__":
    cfg = dict(
        hidden_size=32,
        max_lyric_len=8,
        pos_hist_length=8,
        neg_count=3,
        vocab_size=64,
        tracks_num=16,
    )
    B = 2
    N = cfg["neg_count"] + 1

    key = jax.random.PRNGKey(0)
    k_param, k_tgt, k_his = jax.random.split(key, 3)
    params = init_params(k_param, cfg)

    # data[3]: candidate (pos + neg) lyric token ids; data[4]: history lyrics.
    data3 = jax.random.randint(
        k_tgt, (B, N * cfg["max_lyric_len"]), 0, cfg["vocab_size"], dtype=jnp.int32)
    data4 = jax.random.randint(
        k_his, (B, cfg["pos_hist_length"] * cfg["max_lyric_len"]), 0,
        cfg["vocab_size"], dtype=jnp.int32)
    data = {3: data3, 4: data4}

    out = pnrec_forward(params, data, cfg, test_mode=False)
    out = jax.block_until_ready(out)
    assert out.shape == (B, N) and out.dtype == jnp.float32
    print("KERNEL_OK")
</pallas_src>

<mosaic_0001>
module attributes {stable_mosaic.version = 11 : i64} {
  func.func @_title_pool_kernel(%arg0: i32, %arg1: memref<16x8x32xbf16, #tpu.memory_space<vmem>>, %arg2: memref<32x32xbf16, #tpu.memory_space<vmem>>, %arg3: memref<1x32xf32, #tpu.memory_space<vmem>>, %arg4: memref<1x32xf32, #tpu.memory_space<vmem>>, %arg5: memref<16x32xbf16, #tpu.memory_space<vmem>>) attributes {dimension_semantics = [#tpu.dimension_semantics<parallel>], iteration_bounds = array<i64: 2>, scalar_prefetch = 0 : i64, scratch_operands = 0 : i64, tpu.core_type = #tpu.core_type<tc>, window_params = [{transform_indices = @transform_0, window_bounds = array<i64: 16, 8, 32>}, {pipeline_mode = #tpu.pipeline_mode<synchronous>, transform_indices = @transform_1, window_bounds = array<i64: 32, 32>}, {pipeline_mode = #tpu.pipeline_mode<synchronous>, transform_indices = @transform_2, window_bounds = array<i64: 1, 32>}, {pipeline_mode = #tpu.pipeline_mode<synchronous>, transform_indices = @transform_3, window_bounds = array<i64: 1, 32>}, {transform_indices = @transform_4, window_bounds = array<i64: 16, 32>}]} {
    %c0 = arith.constant 0 : index
    %c0_0 = arith.constant 0 : index
    %c0_1 = arith.constant 0 : index
    %0 = vector.load %arg1[%c0, %c0_0, %c0_1] : memref<16x8x32xbf16, #tpu.memory_space<vmem>>, vector<16x8x32xbf16>
    %1 = vector.shape_cast %0 : vector<16x8x32xbf16> to vector<128x32xbf16>
    %c0_2 = arith.constant 0 : index
    %c0_3 = arith.constant 0 : index
    %2 = vector.load %arg2[%c0_2, %c0_3] : memref<32x32xbf16, #tpu.memory_space<vmem>>, vector<32x32xbf16>
    %cst = arith.constant dense<0.000000e+00> : vector<128x32xf32>
    %3 = tpu.matmul %1, %2, %cst {dimension_numbers = #tpu.dot_dimension_numbers<[1], [0], [0], [1], [0, 0, 1, 1], [], []>} : vector<128x32xbf16>, vector<32x32xbf16>, vector<128x32xf32> -> vector<128x32xf32>
    %c0_4 = arith.constant 0 : index
    %c0_5 = arith.constant 0 : index
    %4 = vector.load %arg3[%c0_4, %c0_5] : memref<1x32xf32, #tpu.memory_space<vmem>>, vector<1x32xf32>
    %5 = vector.broadcast %4 : vector<1x32xf32> to vector<128x32xf32>
    %6 = arith.addf %3, %5 : vector<128x32xf32>
    %7 = arith.truncf %6 : vector<128x32xf32> to vector<128x32xbf16>
    %8 = math.tanh %7 : vector<128x32xbf16>
    %9 = vector.shape_cast %8 : vector<128x32xbf16> to vector<16x8x32xbf16>
    %c0_6 = arith.constant 0 : index
    %c0_7 = arith.constant 0 : index
    %10 = vector.load %arg4[%c0_6, %c0_7] : memref<1x32xf32, #tpu.memory_space<vmem>>, vector<1x32xf32>
    %11 = vector.shape_cast %10 : vector<1x32xf32> to vector<1x1x32xf32>
    %12 = arith.extf %9 : vector<16x8x32xbf16> to vector<16x8x32xf32>
    %13 = vector.broadcast %11 : vector<1x1x32xf32> to vector<16x8x32xf32>
    %14 = arith.mulf %12, %13 : vector<16x8x32xf32>
    %cst_8 = arith.constant dense<0.000000e+00> : vector<16x8xf32>
    %15 = vector.multi_reduction <add>, %14, %cst_8 [2] : vector<16x8x32xf32> to vector<16x8xf32>
    %cst_9 = arith.constant dense<0xFF800000> : vector<16xf32>
    %16 = vector.multi_reduction <maximumf>, %15, %cst_9 [1] : vector<16x8xf32> to vector<16xf32>
    %17 = vector.shape_cast %16 : vector<16xf32> to vector<16x1xf32>
    %18 = vector.broadcast %17 : vector<16x1xf32> to vector<16x8xf32>
    %19 = arith.subf %15, %18 : vector<16x8xf32>
    %20 = math.exp %19 : vector<16x8xf32>
    %cst_10 = arith.constant dense<0.000000e+00> : vector<16xf32>
    %21 = vector.multi_reduction <add>, %20, %cst_10 [1] : vector<16x8xf32> to vector<16xf32>
    %22 = vector.shape_cast %21 : vector<16xf32> to vector<16x1xf32>
    %23 = tpu.reciprocal %22 {approx = true} : vector<16x1xf32> -> vector<16x1xf32>
    %24 = vector.broadcast %23 : vector<16x1xf32> to vector<16x8xf32>
    %25 = arith.mulf %20, %24 : vector<16x8xf32>
    %26 = vector.shape_cast %25 : vector<16x8xf32> to vector<16x8x1xf32>
    %27 = arith.truncf %26 : vector<16x8x1xf32> to vector<16x8x1xbf16>
    %28 = vector.broadcast %27 : vector<16x8x1xbf16> to vector<16x8x32xbf16>
    %29 = arith.mulf %0, %28 : vector<16x8x32xbf16>
    %30 = arith.extf %29 : vector<16x8x32xbf16> to vector<16x8x32xf32>
    %cst_11 = arith.constant dense<0.000000e+00> : vector<16x32xf32>
    %31 = vector.multi_reduction <add>, %30, %cst_11 [1] : vector<16x8x32xf32> to vector<16x32xf32>
    %32 = arith.truncf %31 : vector<16x32xf32> to vector<16x32xbf16>
    %c0_12 = arith.constant 0 : index
    %c0_13 = arith.constant 0 : index
    %33 = vector.load %arg5[%c0_12, %c0_13] : memref<16x32xbf16, #tpu.memory_space<vmem>>, vector<16x32xbf16>
    tpu.vector_store %arg5[%c0_12, %c0_13], %32 {strides = array<i32>} : memref<16x32xbf16, #tpu.memory_space<vmem>>, vector<16x32xbf16>,
    return
  }
  func.func @transform_0(%arg0: i32) -> (i32, i32, i32) {
    %c0_i32 = arith.constant 0 : i32
    %c0_i32_0 = arith.constant 0 : i32
    %c0_i32_1 = arith.constant 0 : i32
    return %arg0, %c0_i32, %c0_i32_0 : i32, i32, i32
  }
  func.func @transform_1(%arg0: i32) -> (i32, i32) {
    %c0_i32 = arith.constant 0 : i32
    %c0_i32_0 = arith.constant 0 : i32
    %c0_i32_1 = arith.constant 0 : i32
    return %c0_i32, %c0_i32_0 : i32, i32
  }
  func.func @transform_2(%arg0: i32) -> (i32, i32) {
    %c0_i32 = arith.constant 0 : i32
    %c0_i32_0 = arith.constant 0 : i32
    %c0_i32_1 = arith.constant 0 : i32
    return %c0_i32, %c0_i32_0 : i32, i32
  }
  func.func @transform_3(%arg0: i32) -> (i32, i32) {
    %c0_i32 = arith.constant 0 : i32
    %c0_i32_0 = arith.constant 0 : i32
    %c0_i32_1 = arith.constant 0 : i32
    return %c0_i32, %c0_i32_0 : i32, i32
  }
  func.func @transform_4(%arg0: i32) -> (i32, i32) {
    %c0_i32 = arith.constant 0 : i32
    %c0_i32_0 = arith.constant 0 : i32
    return %arg0, %c0_i32 : i32, i32
  }
}

</mosaic_0001>

<bundles_post_ra>
// kernel: tpu_custom_call.1
= control target key start
LH: loop header
LB: loop body
LE: loop exit
PB: predicated region body
PF: predicated region fallthrough
CT: control target
= control target key end

     0   :  { %9 = vsyncpa [#allocation3], 0  ;;  %s2549_s0 = inlined_call_operand.hbm [shape: bf16[32,8,32], index: 0, kind: input, shape index: {}]   ;;  %s2550_s1 = inlined_call_operand.hbm [shape: bf16[32,32], index: 1, kind: input, shape index: {}]   ;;  %s2551_s2 = inlined_call_operand.vmem [shape: f32[1,32], index: 2, kind: input, shape index: {}]   ;;  %s2552_s3 = inlined_call_operand.vmem [shape: f32[1,32], index: 3, kind: input, shape index: {}]   ;;  %s2553_s4 = inlined_call_operand.hbm [shape: bf16[32,32], index: 4, kind: output, shape index: {}]  }
   0x1   :  { %11 = vsyncpa [#allocation3 + $0x1], 0 }
   0x2   :  { %12 = vsyncpa [#allocation6], 0 }
   0x3   :  { %13 = vsyncpa [#allocation4], 0 }
   0x4   :  { %15 = vsyncpa [#allocation4 + $0x1], 0  ;;  %s1941_s15 = smov 0   ;;  %s1943_s16 = smov 0  }
   0x5   :  { %s1945_s17 = smov 0   ;;  %s1947_s18 = smov 0  }
   0x6 LB: > { %s1962_s19 = sadd.s32 4294967295, %s1906_s18   ;;  %s1524_s20 = sadd.s32 4294967294, %s1906_s18   ;;  %s1906_s18 = sphi %s1947_s18, %s2573_s18   ;;  %s1902_s17 = sphi %s1945_s17, %s2572_s17   ;;  %s1898_s16 = sphi %s1943_s16, %s2571_s16   ;;  %s1894_s15 = sphi %s1941_s15, %s2570_s15  }
   0x7   : > { %p41_p0 = scmp.ne.s32.totalorder %s1898_s16, %s1894_s15  ;;  %p2554_p1 = scmp.eq.s32.totalorder %s1962_s19, 0 }
   0x8   : > { %p134_p3 = scmp.eq.s32.totalorder %s1524_s20, 1  ;;  %p1525_p5 = scmp.ge.s32.totalorder %s1906_s18, 1 }
   0x9   : > { %p1971_p4 = por %p2554_p1, %p41_p0  ;;  %p141_p7 = scmp.lt.s32.totalorder %s1906_s18, 3 }
   0xa   : > { %p1976_p6 = por %p134_p3, %p41_p0  ;;  %s1908_s24 = smov [#allocation5]  }
   0xb   : > { %s2557_s21 = scalar_select %p1971_p4, 1, 0 }
   0xc   : > { %s2558_s22 = scalar_select %p1976_p6, 1, 0 }
   0xd   : > { %p1981_p8 = pnand %p1525_p5, %p141_p7  ;;  %s153_s25 = sshll.u32 %s1908_s24, 4  ;;  %s1985_s25 = int_to_ptr.vmem [resolvable:$true] %s153_s25 }
   0xe   : > { %s1997_s27 = sadd.s32 1, %s1906_s18   ;;  %s28_s28 = sadd.s32 1, %s1902_s17 }
   0xf   : > { %s2559_s23 = scalar_select %p1981_p8, 1, 0 }
  0x10   : > { %p1652_p9 = pneg %p1981_p8  ;;  %s25_s29 = ssub.s32 %s1906_s18, %s1997_s27 }
  0x11   : > { %s1778_s6 = scalar_lea.hbm %s2550_s1, 256 }
  0x12   : > { %p1992_p11 = pnand %p1652_p9, %p2554_p1  ;;  %p1779_p12 = scmp.ne.s32.totalorder %s2550_s1, %s1778_s6 }
  0x13   : > { %p1785_p5 = scmp.lt.u32.totalorder %s1778_s6, %s2550_s1 }
  0x14   : > { %p1780_p13 = pneg %p1992_p11 }
  0x16   : > { %p1781_p0 = pnand %p1780_p13, %p1779_p12 }
  0x18   : > { %p1782_p3 = pneg %p1781_p0 }
  0x1a   : > { %p1787_p7 = pnand %p1785_p5, %p1782_p3 }
  0x1c   : > { %1790 = shalt.err (!%p1787_p7)
}
  0x1d   : > { %s1791_s11 = scalar_lea.vmem %s1985_s25, 256  ;;  %p1799_p2 = scmp.lt.s32.totalorder %s1985_s25, %s1985_s25 }
  0x1e   : > { %p1792_p9 = scmp.ne.s32.totalorder %s1985_s25, %s1791_s11  ;;  %p1800_p6 = scmp.lt.s32.totalorder %s1791_s11, %s1791_s11 }
  0x20   : > { %p1794_p10 = pnand %p1792_p9, %p1780_p13  ;;  %p1801_p4 = por %p1800_p6, %p1799_p2 }
  0x22   : > { %p1795_p1 = pneg %p1794_p10 }
  0x24   : > { %p1802_p8 = pnand %p1801_p4, %p1795_p1 }
  0x26   : > { %1805 = shalt.err (!%p1802_p8)
}
  0x27   : > { %s1909_s12 = smov 64   ;;  %s1910_s13 = smov 4  }
  0x28   : > { %1655 = dma.hbm_to_vmem [thread:$0]  (!%p1992_p11), %s2550_s1, 256, %s1985_s25, [#allocation6], %s1909_s12, %s1909_s12, %s1910_s13  }
  0x29   : > { %p26_p1 = scmp.eq.s32.totalorder %s25_s29, 0  ;;  %p35_p2 = scmp.ne.s32.totalorder %s1902_s17, %s1898_s16 }
  0x2a   : > { %p36_p4 = scmp.eq.s32.totalorder %s1906_s18, 0  ;;  %p1665_p6 = scmp.lt.s32.totalorder %s1906_s18, 2 }
  0x2b   : > { %s2031_s24 = scalar_select %p26_p1, %s1902_s17, %s28_s28  }
  0x2c   : > { %p37_p8 = por %p36_p4, %p35_p2  ;;  %p2561_p10 = scmp.eq.s32.totalorder %s1962_s19, 1 }
  0x2d   : > { %s173_s26 = sand.u32 1, %s1902_s17   ;;  %s1592_s5 = sshll.u32 %s1906_s18, 10 }
  0x2e   : > { %p2035_p12 = por %p2561_p10, %p35_p2  ;;  %s1528_s6 = sshll.u32 %s173_s26, 6 }
  0x2f   : > { %s2044_s9 = scalar_lea.hbm %s2549_s0, %s1592_s5  ;;  %s177_s25 = scalar_lea.vmem [#allocation2], %s1528_s6 }
  0x30   : > { %s184_s28 = sshll.u32 %s177_s25, 4  ;;  %p2046_p11 = pnand %p1665_p6, %p37_p8  ;;  %s2050_s28 = int_to_ptr.vmem [resolvable:$true] %s184_s28 }
  0x31   : > { %s2052_s10 = scalar_lea.sflag [#allocation3], %s173_s26  ;;  %s1806_s11 = scalar_lea.hbm %s2044_s9, 1024 }
  0x32   : > { %p1807_p13 = scmp.ne.s32.totalorder %s2044_s9, %s1806_s11  ;;  %p1808_p0 = pneg %p2046_p11 }
  0x33   : > { %s1811_s5 = scalar_lea.hbm %s2549_s0, 2048  ;;  %p1812_p7 = scmp.lt.u32.totalorder %s2044_s9, %s2549_s0 }
  0x34   : > { %p1809_p3 = pnand %p1808_p0, %p1807_p13  ;;  %p1813_p9 = scmp.lt.u32.totalorder %s1811_s5, %s1806_s11 }
  0x35   : > { %p1815_p2 = scmp.lt.u32.totalorder %s1806_s11, %s2044_s9 }
  0x36   : > { %p1810_p5 = pneg %p1809_p3  ;;  %p1814_p1 = por %p1813_p9, %p1812_p7 }
  0x38   : > { %p1816_p4 = por %p1815_p2, %p1814_p1 }
  0x3a   : > { %p1817_p6 = pnand %p1816_p4, %p1810_p5 }
  0x3c   : > { %1820 = shalt.err (!%p1817_p6)
}
  0x3d   : > { %s1821_s26 = scalar_lea.vmem %s2050_s28, 1024  ;;  %s1911_s8 = smov [#allocation2]  }
  0x3e   : > { %p1822_p8 = scmp.ne.s32.totalorder %s2050_s28, %s1821_s26  ;;  %s1826_s25 = sshll.u32 %s1911_s8, 4  ;;  %s1827_s25 = int_to_ptr.vmem [resolvable:$false] %s1826_s25 }
  0x3f   : > { %s1828_s14 = scalar_lea.vmem %s1827_s25, 2048  ;;  %p1829_p3 = scmp.lt.s32.totalorder %s2050_s28, %s1827_s25 }
  0x40   : > { %p1824_p10 = pnand %p1822_p8, %p1808_p0  ;;  %p1830_p7 = scmp.lt.s32.totalorder %s1828_s14, %s1821_s26 }
  0x42   : > { %p1825_p13 = pneg %p1824_p10  ;;  %p1831_p9 = por %p1830_p7, %p1829_p3 }
  0x44   : > { %p1832_p1 = pnand %p1831_p9, %p1825_p13 }
  0x46   : > { %1835 = shalt.err (!%p1832_p1)
}
  0x47   : > { %1659 = dma.hbm_to_vmem [thread:$0]  (!%p2046_p11), %s2044_s9, 1024, %s2050_s28, %s2052_s10, %s1909_s12, %s1909_s12, %s1910_s13  }
  0x48   : > { %p2564_p0 = scmp.ne.s32.totalorder %s2559_s23, 0 }
  0x49   : > { %s2086_s11 = sand.u32 (!%p2564_p0), 1, %s1898_s16   ;;  %p2565_p5 = scmp.ne.s32.totalorder (!%p2564_p0), %s2557_s21, 0 }
  0x4a   : > { %196 = sbr.rel (%p2564_p0) target bundleno = 1196 (0x4ac), region = 36  ;;  %s1532_s20 = sshll.u32 (!%p2564_p0), %s2086_s11, 6 }
  0x4b   : > { %s199_s5 = scalar_lea.sflag (!%p2564_p0), [#allocation3], %s2086_s11  ;;  %s2090_s6 = scalar_lea.vmem (!%p2564_p0), [#allocation2], %s1532_s20 }
  0x51   : > { %1881 = dma.done.wait (%p2565_p5), %s199_s5, 1024  }
  0x52   : > { %1883 = vsyncadd (%p2565_p5), %s199_s5, 4294966272  ;;  %p2566_p11 = scmp.eq.s32.totalorder %s1962_s19, 0 }
  0x54   : > { %1885 = dma.done.wait (%p2566_p11), [#allocation6], 256   ;;  %p2567_p2 = pmov %p2566_p11 }
  0x55   : > { %v1708_v0 = vld [vmem:[#allocation5] sm:$0xff]   ;;  %v1709_v1 = vld [vmem:[#allocation5 + $0x8] sm:$0xff]   ;;  %vm313_vm0 = vcmask 261120   ;;  %v238_v12 = vld [vmem:[%s2090_s6 + $0x10] sm:$0xf]  ;;  %vm676_vm1 = vcmask 1041409  }
  0x56   : > { %1887 = vsyncadd (%p2567_p2), [#allocation6], 4294967040  ;;  %1620 = vmatprep.subr.bf16.mxu0 %v1708_v0  ;;  %1640 = vmatprep.subr.bf16.mxu1 %v1708_v0  ;;  %v2101_v2 = vld [vmem:[%s2090_s6] sm:$0xf]  ;;  %v2104_v3 = vld [vmem:[%s2090_s6 + $0x4] sm:$0xf] }
  0x57   : > { %v2107_v4 = vld [vmem:[%s2090_s6 + $0x20] sm:$0xf]  ;;  %1621 = vmatpush3.bf16.msra.mxu0 %v1708_v0  ;;  %1642 = vmatpush3.bf16.msra.mxu1 %v1708_v0  ;;  %v1536_v5 = vcombine.low %v2101_v2, %v2104_v3  ;;  %v2112_v6 = vld [vmem:[%s2090_s6 + $0x24] sm:$0xf]  ;;  %v2115_v7 = vld [vmem:[%s2090_s6 + $0x8] sm:$0xf] }
  0x58   : > { %v2118_v8 = vld [vmem:[%s2090_s6 + $0xc] sm:$0xf]  ;;  %1622 = vmatprep.subr.bf16.mxu0 %v1709_v1  ;;  %1641 = vmatprep.subr.bf16.mxu1 %v1709_v1  ;;  %v1540_v9 = vcombine.low %v2107_v4, %v2112_v6  ;;  %v2123_v10 = vld [vmem:[%s2090_s6 + $0x28] sm:$0xf]  ;;  %v239_v13 = vld [vmem:[%s2090_s6 + $0x14] sm:$0xf] }
  0x59   : > { %v2126_v11 = vld [vmem:[%s2090_s6 + $0x2c] sm:$0xf]  ;;  %1624 = vmatprep.mubr.msk.bf16.mxu0 %vm313_vm0, %v1536_v5  ;;  %v1537_v14 = vcombine.low %v2115_v7, %v2118_v8  ;;  %v246_v16 = vld [vmem:[%s2090_s6 + $0x30] sm:$0xf]  ;;  %v247_v17 = vld [vmem:[%s2090_s6 + $0x34] sm:$0xf]  ;;  %v1538_v18 = vcombine.low %v238_v12, %v239_v13 }
  0x5a   : > { %1632 = vmatprep.mubr.msk.bf16.mxu1 %vm313_vm0, %v1540_v9  ;;  %v1541_v15 = vcombine.low %v2123_v10, %v2126_v11  ;;  %v1542_v19 = vcombine.low %v246_v16, %v247_v17  ;;  %v240_v20 = vld [vmem:[%s2090_s6 + $0x18] sm:$0xf]  ;;  %v241_v21 = vld [vmem:[%s2090_s6 + $0x1c] sm:$0xf]  ;;  %v1535_v27 = vld [vmem:[%s2551_s2] ss:$0 sm:$0xff] }
  0x5b   : > { %1623 = vmatpush3.bf16.msra.mxu0 %v1709_v1  ;;  %1643 = vmatpush3.bf16.msra.mxu1 %v1709_v1  ;;  %v248_v22 = vld [vmem:[%s2090_s6 + $0x38] sm:$0xf]  ;;  %v249_v23 = vld [vmem:[%s2090_s6 + $0x3c] sm:$0xf]  ;;  %v1539_v24 = vcombine.low %v240_v20, %v241_v21  ;;  %v2154_v17 = vld [vmem:[%s2552_s3] ss:$0 sm:$0xff] }
  0x5c   : > { %v1543_v25 = vcombine.low %v248_v22, %v249_v23  ;;  %vm678_vm2 = vcmask 1042434   ;;  %vm680_vm3 = vcmask 1043459   ;;  %vm682_vm4 = vcmask 1044484   ;;  %s1534_s9 = sshll.u32 %s2086_s11, 3  ;;  %s1609_s28 = sshll.u32 %s1962_s19, 7 }
  0x5d   : > { %vm684_vm5 = vcmask 1045509   ;;  %vm686_vm6 = vcmask 1046534   ;;  %vm688_vm7 = vcmask 1047559   ;;  %vm699_vm8 = vcmask 64512   ;;  %s230_s29 = scalar_lea.vmem [#allocation7], %s1534_s9  ;;  %s2503_s26 = scalar_lea.hbm %s2553_s4, %s1609_s28 }
  0x5e   : > { %1625 = vmatmul.mubr.msk.bf16.vlgmr.msra.gmra.mrb[0].mxu0 %vm313_vm0, %v1537_v14  ;;  %1633 = vmatmul.mubr.msk.bf16.vlgmr.msra.gmra.mrb[0].mxu1 %vm313_vm0, %v1541_v15  ;;  %s1441_s10 = sshll.u32 %s230_s29, 4  ;;  %vm1424_vm9 = vcmask 257024   ;;  %s1428_s8 = scalar_lea.sflag [#allocation4], %s2086_s11  ;;  %s2505_s10 = int_to_ptr.vmem [resolvable:$true] %s1441_s10 }
  0x5f   : > { %1628 = vmatprep.mubr.msk.bf16.mxu0 %vm313_vm0, %v1538_v18  ;;  %1636 = vmatprep.mubr.msk.bf16.mxu1 %vm313_vm0, %v1542_v19  ;;  %s1836_s25 = scalar_lea.vmem %s2505_s10, 128  ;;  %s1913_s14 = smov [#allocation7]  }
  0x60   : > { %p1837_p4 = scmp.ne.s32.totalorder %s2505_s10, %s1836_s25  ;;  %s1840_s20 = sshll.u32 %s1913_s14, 4  ;;  %s1841_s20 = int_to_ptr.vmem [resolvable:$false] %s1840_s20 }
  0x61   : > { %s1842_s5 = scalar_lea.vmem %s1841_s20, 256  ;;  %p1843_p10 = scmp.lt.s32.totalorder %s2505_s10, %s1841_s20 }
  0x62   : > { %p1838_p6 = pnand %p1837_p4, %p2035_p12  ;;  %p1844_p13 = scmp.lt.s32.totalorder %s1842_s5, %s1836_s25 }
  0x64   : > { %p1839_p8 = pneg %p1838_p6  ;;  %p1845_p3 = por %p1844_p13, %p1843_p10 }
  0x66   : > { %1629 = vmatmul.mubr.msk.bf16.gmra.mrb[4].mxu0 %vm313_vm0, %v1539_v24  ;;  %1637 = vmatmul.mubr.msk.bf16.gmra.mrb[4].mxu1 %vm313_vm0, %v1543_v25  ;;  %p1846_p7 = pnand %p1845_p3, %p1839_p8 }
 0x131   : > { %v1626_v26 = vpop.f32.mrb[0].mxu0  ;;  %v1634_v28 = vpop.f32.mrb[0].mxu1 }
 0x132   : > { %v413_v29 = vadd.f32 %v1634_v28, %v1535_v27  ;;  %v372_v30 = vpop.f32.mrb[1].mxu0  ;;  %v404_v31 = vpop.f32.mrb[1].mxu1  ;;  %v381_v35 = vadd.f32 %v1626_v26, %v1535_v27 }
 0x133   : > { %v405_v32 = vadd.f32 %v1535_v27, %v404_v31  ;;  %v1627_v33 = vpop.f32.mrb[2].mxu0  ;;  %v1635_v34 = vpop.f32.mrb[2].mxu1  ;;  %v373_v40 = vadd.f32 %v1535_v27, %v372_v30 }
 0x134   : > { %v384_v36 = vadd.f32 %v1627_v33, %v1535_v27  ;;  %v416_v37 = vadd.f32 %v1635_v34, %v1535_v27  ;;  %v375_v38 = vpop.f32.mrb[3].mxu0  ;;  %v407_v39 = vpop.f32.mrb[3].mxu1 }
 0x135   : > { %v376_v41 = vadd.f32 %v1535_v27, %v375_v38  ;;  %v408_v42 = vadd.f32 %v1535_v27, %v407_v39 }
 0x136   : > { %v436_v43 = vpack.c.bf16 %v384_v36, %v381_v35  ;;  %v440_v44 = vpack.c.bf16 %v416_v37, %v413_v29 }
 0x137   : > { %v435_v45 = vpack.c.bf16 %v376_v41, %v373_v40  ;;  %v439_v46 = vpack.c.bf16 %v408_v42, %v405_v32 }
 0x138   : > { %1718 = vtanh.bf16 %v436_v43 }
 0x139   : > { %1720 = vtanh.bf16 %v440_v44  ;;  %v1630_v47 = vpop.f32.mrb[4].mxu0  ;;  %v1638_v48 = vpop.f32.mrb[4].mxu1 }
 0x13a   : > { %1722 = vtanh.bf16 %v435_v45  ;;  %v397_v49 = vadd.f32 %v1630_v47, %v1535_v27  ;;  %v388_v50 = vpop.f32.mrb[5].mxu0  ;;  %v429_v51 = vadd.f32 %v1638_v48, %v1535_v27  ;;  %v420_v52 = vpop.f32.mrb[5].mxu1 }
 0x13b   : > { %1724 = vtanh.bf16 %v439_v46  ;;  %v389_v53 = vadd.f32 %v1535_v27, %v388_v50  ;;  %v1631_v54 = vpop.f32.mrb[6].mxu0  ;;  %v421_v55 = vadd.f32 %v1535_v27, %v420_v52  ;;  %v1639_v56 = vpop.f32.mrb[6].mxu1 }
 0x13c   : > { %v400_v57 = vadd.f32 %v1631_v54, %v1535_v27  ;;  %v391_v58 = vpop.f32.mrb[7].mxu0  ;;  %v432_v59 = vadd.f32 %v1639_v56, %v1535_v27  ;;  %v423_v60 = vpop.f32.mrb[7].mxu1 }
 0x13d   : > { %v392_v61 = vadd.f32 %v1535_v27, %v391_v58  ;;  %v424_v62 = vadd.f32 %v1535_v27, %v423_v60 }
 0x13e   : > { %v438_v63 = vpack.c.bf16 %v400_v57, %v397_v49  ;;  %v442_v0 = vpack.c.bf16 %v432_v59, %v429_v51 }
 0x13f   : > { %v437_v1 = vpack.c.bf16 %v392_v61, %v389_v53  ;;  %v441_v5 = vpack.c.bf16 %v424_v62, %v421_v55 }
 0x140   : > { %1726 = vtanh.bf16 %v438_v63 }
 0x141   : > { %1728 = vtanh.bf16 %v442_v0 }
 0x142   : > { %1730 = vtanh.bf16 %v437_v1 }
 0x143   : > { %v1719_v9 = vpop.eup %1718  ;;  %1732 = vtanh.bf16 %v441_v5 }
 0x144   : > { %v1721_v12 = vpop.eup %1720  ;;  %v1556_v13 = vcombine.low %v1719_v9, %v1719_v9  ;;  %v1557_v14 = vcombine.high %v1719_v9, %v1719_v9 }
 0x145   : > { %v1723_v15 = vpop.eup %1722  ;;  %v1564_v16 = vcombine.low %v1721_v12, %v1721_v12  ;;  %v1565_v18 = vcombine.high %v1721_v12, %v1721_v12 }
 0x146   : > { %v1725_v19 = vpop.eup %1724  ;;  %v510_v20 = vunpack.c.l.bf16 %v1556_v13  ;;  %v511_v21 = vunpack.c.l.bf16 %v1557_v14  ;;  %v1554_v22 = vcombine.low %v1723_v15, %v1723_v15  ;;  %v1555_v28 = vcombine.high %v1723_v15, %v1723_v15 }
 0x147   : > { %v518_v23 = vunpack.c.l.bf16 %v1564_v16  ;;  %v519_v24 = vunpack.c.l.bf16 %v1565_v18  ;;  %v1562_v25 = vcombine.low %v1725_v19, %v1725_v19  ;;  %v1563_v36 = vcombine.high %v1725_v19, %v1725_v19 }
 0x148   : > { %v532_v26 = vmul.f32 %v2154_v17, %v510_v20  ;;  %v533_v30 = vmul.f32 %v2154_v17, %v511_v21  ;;  %v508_v31 = vunpack.c.l.bf16 %v1554_v22  ;;  %v509_v38 = vunpack.c.l.bf16 %v1555_v28 }
 0x149   : > { %v540_v27 = vmul.f32 %v2154_v17, %v518_v23  ;;  %v541_v34 = vmul.f32 %v2154_v17, %v519_v24  ;;  %v516_v35 = vunpack.c.l.bf16 %v1562_v25  ;;  %v517_v46 = vunpack.c.l.bf16 %v1563_v36 }
 0x14a   : > { %v552_v29 = vsel %vm313_vm0, %v532_v26, 0.0  ;;  %v555_v39 = vsel %vm313_vm0, %v533_v30, 0.0  ;;  %v530_v40 = vmul.f32 %v2154_v17, %v508_v31  ;;  %v531_v50 = vmul.f32 %v2154_v17, %v509_v38 }
 0x14b   : > { %v1727_v32 = vpop.eup %1726  ;;  %v576_v33 = vsel %vm313_vm0, %v540_v27, 0.0  ;;  %553 = vadd.xlane.f32.xlu0 %v552_v29  ;;  %v579_v44 = vsel %vm313_vm0, %v541_v34, 0.0  ;;  %v538_v45 = vmul.f32 %v2154_v17, %v516_v35  ;;  %v539_v54 = vmul.f32 %v2154_v17, %v517_v46 }
 0x14c   : > { %577 = vadd.xlane.f32.xlu1 %v576_v33  ;;  %v1729_v37 = vpop.eup %1728  ;;  %v1560_v42 = vcombine.low %v1727_v32, %v1727_v32  ;;  %v546_v49 = vsel %vm313_vm0, %v530_v40, 0.0  ;;  %v549_v57 = vsel %vm313_vm0, %v531_v50, 0.0  ;;  %v1561_v12 = vcombine.high %v1727_v32, %v1727_v32 }
 0x14d   : > { %v1568_v41 = vcombine.low %v1729_v37, %v1729_v37  ;;  %v1731_v43 = vpop.eup %1730  ;;  %v570_v53 = vsel %vm313_vm0, %v538_v45, 0.0  ;;  %v573_v61 = vsel %vm313_vm0, %v539_v54, 0.0  ;;  %v1569_v15 = vcombine.high %v1729_v37, %v1729_v37 }
 0x14e   : > { %v1733_v47 = vpop.eup %1732  ;;  %v514_v51 = vunpack.c.l.bf16 %v1560_v42  ;;  %v1558_v52 = vcombine.low %v1731_v43, %v1731_v43  ;;  %v1559_v60 = vcombine.high %v1731_v43, %v1731_v43  ;;  %v515_v19 = vunpack.c.l.bf16 %v1561_v12 }
 0x14f   : > { %556 = vadd.xlane.f32.xlu0 %v555_v39  ;;  %v522_v48 = vunpack.c.l.bf16 %v1568_v41  ;;  %v1566_v55 = vcombine.low %v1733_v47, %v1733_v47  ;;  %v1567_v63 = vcombine.high %v1733_v47, %v1733_v47  ;;  %v523_v22 = vunpack.c.l.bf16 %v1569_v15 }
 0x150   : > { %580 = vadd.xlane.f32.xlu1 %v579_v44  ;;  %v536_v58 = vmul.f32 %v2154_v17, %v514_v51  ;;  %v512_v59 = vunpack.c.l.bf16 %v1558_v52  ;;  %v513_v9 = vunpack.c.l.bf16 %v1559_v60  ;;  %v537_v24 = vmul.f32 %v2154_v17, %v515_v19 }
 0x151   : > { %v544_v56 = vmul.f32 %v2154_v17, %v522_v48  ;;  %v520_v62 = vunpack.c.l.bf16 %v1566_v55  ;;  %v521_v14 = vunpack.c.l.bf16 %v1567_v63  ;;  %v545_v26 = vmul.f32 %v2154_v17, %v523_v22 }
 0x152   : > { %v564_v1 = vsel %vm313_vm0, %v536_v58, 0.0  ;;  %v534_v5 = vmul.f32 %v2154_v17, %v512_v59  ;;  %v535_v18 = vmul.f32 %v2154_v17, %v513_v9  ;;  %v567_v27 = vsel %vm313_vm0, %v537_v24, 0.0 }
 0x153   : > { %547 = vadd.xlane.f32.xlu0 %v546_v49  ;;  %v588_v0 = vsel %vm313_vm0, %v544_v56, 0.0  ;;  %v542_v13 = vmul.f32 %v2154_v17, %v520_v62  ;;  %v543_v21 = vmul.f32 %v2154_v17, %v521_v14  ;;  %v591_v28 = vsel %vm313_vm0, %v545_v26, 0.0 }
 0x154   : > { %571 = vadd.xlane.f32.xlu1 %v570_v53  ;;  %v558_v16 = vsel %vm313_vm0, %v534_v5, 0.0  ;;  %v561_v23 = vsel %vm313_vm0, %v535_v18, 0.0  ;;  %v610_v32 = vlaneseq }
 0x155   : > { %v582_v20 = vsel %vm313_vm0, %v542_v13, 0.0  ;;  %v585_v25 = vsel %vm313_vm0, %v543_v21, 0.0 }
 0x156   : > { %v611_v35 = vand.u32 127, %v610_v32  ;;  %v2198_v17 = vshrl.u32 %v610_v32, 7 }
 0x157   : > { %550 = vadd.xlane.f32.xlu0 %v549_v57 }
 0x158   : > { %574 = vadd.xlane.f32.xlu1 %v573_v61  ;;  %v2205_v38 = vsub.s32 %v611_v35, %v2198_v17  ;;  %v2265_v26 = vsub.s32 0, %v2198_v17  ;;  %v2273_v32 = vsub.s32 4, %v2198_v17 }
 0x15b   : > { %565 = vadd.xlane.f32.xlu0 %v564_v1 }
 0x15c   : > { %589 = vadd.xlane.f32.xlu1 %v588_v0 }
 0x15f   : > { %559 = vadd.xlane.f32.xlu0 %v558_v16 }
 0x160   : > { %583 = vadd.xlane.f32.xlu1 %v582_v20 }
 0x163   : > { %562 = vadd.xlane.f32.xlu0 %v561_v23 }
 0x164   : > { %586 = vadd.xlane.f32.xlu1 %v585_v25  ;;  %v1912_v25 = vmov 0  }
 0x165   : > { %1707 = vset.pattern.permute.xlu1 %v1912_v25  ;;  %1706 = vset.pattern.permute.xlu0 %v1912_v25 }
 0x167   : > { %568 = vadd.xlane.f32.xlu0 %v567_v27  ;;  %v2268_v27 = vsub.s32 1, %v2198_v17 }
 0x168   : > { %592 = vadd.xlane.f32.xlu1 %v591_v28 }
 0x1d8   : > { %v2188_v29 = vpop.xlane.xlu0 %553 }
 0x1d9   : > { %v2190_v30 = vpop.xlane.xlu1 %577  ;;  %v623_v47 = vrot.slane %v2188_v29, %v2205_v38 }
 0x1da   : > { %v655_v50 = vrot.slane %v2190_v30, %v2205_v38 }
 0x1dc   : > { %v2192_v31 = vpop.xlane.xlu0 %556 }
 0x1dd   : > { %v2194_v33 = vpop.xlane.xlu1 %580  ;;  %v627_v54 = vrot.slane %v2192_v31, %v2205_v38 }
 0x1de   : > { %v659_v57 = vrot.slane %v2194_v33, %v2205_v38 }
 0x1e0   : > { %v2196_v34 = vpop.xlane.xlu0 %547 }
 0x1e1   : > { %v2200_v36 = vpop.xlane.xlu1 %571  ;;  %v615_v43 = vrot.slane %v2196_v34, %v2205_v38 }
 0x1e2   : > { %v647_v45 = vrot.slane %v2200_v36, %v2205_v38 }
 0x1e4   : > { %v2202_v37 = vpop.xlane.xlu0 %550 }
 0x1e5   : > { %v2207_v39 = vpop.xlane.xlu1 %574  ;;  %v619_v40 = vrot.slane %v2202_v37, %v2205_v38 }
 0x1e6   : > { %v651_v41 = vrot.slane %v2207_v39, %v2205_v38 }
 0x1e7   : > { %v677_v46 = vsel %vm676_vm1, %v619_v40, %v615_v43  ;;  %v2280_v43 = vsub.s32 5, %v2198_v17 }
 0x1e8   : > { %v2213_v42 = vpop.xlane.xlu0 %565  ;;  %v690_v48 = vsel %vm676_vm1, %v651_v41, %v647_v45  ;;  %v679_v52 = vsel %vm678_vm2, %v623_v47, %v677_v46 }
 0x1e9   : > { %v2217_v44 = vpop.xlane.xlu1 %589  ;;  %v691_v55 = vsel %vm678_vm2, %v655_v50, %v690_v48  ;;  %v681_v59 = vsel %vm680_vm3, %v627_v54, %v679_v52  ;;  %v639_v9 = vrot.slane %v2213_v42, %v2205_v38  ;;  %v2287_v50 = vsub.s32 6, %v2198_v17 }
 0x1ea   : > { %v692_v62 = vsel %vm680_vm3, %v659_v57, %v691_v55  ;;  %v671_v14 = vrot.slane %v2217_v44, %v2205_v38  ;;  %v2291_v55 = vsub.s32 2, %v2198_v17 }
 0x1ec   : > { %v2225_v49 = vpop.xlane.xlu0 %559 }
 0x1ed   : > { %v584_v51 = vpop.xlane.xlu1 %583  ;;  %v631_v53 = vrot.slane %v2225_v49, %v2205_v38 }
 0x1ee   : > { %v663_v56 = vrot.slane %v584_v51, %v2205_v38 }
 0x1ef   : > { %v683_v63 = vsel %vm682_vm4, %v631_v53, %v681_v59 }
 0x1f0   : > { %v2238_v58 = vpop.xlane.xlu0 %562  ;;  %v693_v1 = vsel %vm682_vm4, %v663_v56, %v692_v62 }
 0x1f1   : > { %v587_v60 = vpop.xlane.xlu1 %586  ;;  %v635_v61 = vrot.slane %v2238_v58, %v2205_v38 }
 0x1f2   : > { %v667_v0 = vrot.slane %v587_v60, %v2205_v38 }
 0x1f3   : > { %v685_v5 = vsel %vm684_vm5, %v635_v61, %v683_v63  ;;  %v2296_v61 = vsub.s32 7, %v2198_v17 }
 0x1f4   : > { %v2250_v12 = vpop.xlane.xlu0 %568  ;;  %v694_v13 = vsel %vm684_vm5, %v667_v0, %v693_v1  ;;  %v687_v19 = vsel %vm686_vm6, %v639_v9, %v685_v5  ;;  %v2303_v1 = vsub.s32 3, %v2198_v17 }
 0x1f5   : > { %v593_v15 = vpop.xlane.xlu1 %592  ;;  %v643_v16 = vrot.slane %v2250_v12, %v2205_v38  ;;  %v695_v20 = vsel %vm686_vm6, %v671_v14, %v694_v13 }
 0x1f6   : > { %v675_v18 = vrot.slane %v593_v15, %v2205_v38 }
 0x1f7   : > { %v689_v21 = vsel %vm688_vm7, %v643_v16, %v687_v19 }
 0x1f8   : > { %v696_v22 = vsel %vm688_vm7, %v675_v18, %v695_v20  ;;  %v700_v23 = vsel %vm699_vm8, %v689_v21, -inf }
 0x1f9   : > { %v703_v24 = vsel %vm699_vm8, %v696_v22, -inf  ;;  %701 = vmax.xlane.f32.xlu0 %v700_v23 }
 0x1fa   : > { %704 = vmax.xlane.f32.xlu1 %v703_v24 }
 0x286   : > { %v2270_v28 = vpop.xlane.xlu0 %701 }
 0x287   : > { %v705_v35 = vpop.xlane.xlu1 %704  ;;  %v711_v40 = vrot.slane %v2270_v28, %v2265_v26  ;;  %v715_v41 = vrot.slane %v2270_v28, %v2268_v27  ;;  %v719_v0 = vrot.slane %v2270_v28, %v2291_v55  ;;  %v723_v17 = vrot.slane %v2270_v28, %v2303_v1 }
 0x288   : > { %v759_v45 = vrot.slane %v705_v35, %v2273_v32  ;;  %v743_v46 = vrot.slane %v705_v35, %v2265_v26  ;;  %v763_v52 = vrot.slane %v705_v35, %v2280_v43  ;;  %v747_v56 = vrot.slane %v705_v35, %v2268_v27 }
 0x289   : > { %v788_v47 = vsub.f32 %v2196_v34, %v711_v40  ;;  %v789_v48 = vsub.f32 %v2202_v37, %v715_v41  ;;  %v767_v34 = vrot.slane %v705_v35, %v2287_v50  ;;  %v727_v25 = vrot.slane %v2270_v28, %v2273_v32 }
 0x28a   : > { %v800_v53 = vsub.f32 %v584_v51, %v759_v45  ;;  %v796_v57 = vsub.f32 %v2200_v36, %v743_v46  ;;  %v801_v37 = vsub.f32 %v587_v60, %v763_v52  ;;  %v797_v63 = vsub.f32 %v2207_v39, %v747_v56 }
 0x28b   : > { %v804_v54 = vmul.f32 1.442695, %v788_v47  ;;  %v806_v59 = vmul.f32 1.442695, %v789_v48  ;;  %v771_v36 = vrot.slane %v705_v35, %v2296_v61  ;;  %v802_v5 = vsub.f32 %v2217_v44, %v767_v34 }
 0x28c   : > { %v828_v62 = vmul.f32 1.442695, %v800_v53  ;;  %v820_v51 = vmul.f32 1.442695, %v796_v57  ;;  %v830_v9 = vmul.f32 1.442695, %v801_v37  ;;  %v751_v60 = vrot.slane %v705_v35, %v2291_v55 }
 0x28d   : > { %1734 = vpow2.f32 %v804_v54  ;;  %v822_v13 = vmul.f32 1.442695, %v797_v63  ;;  %v790_v39 = vsub.f32 %v2188_v29, %v719_v0  ;;  %v803_v14 = vsub.f32 %v593_v15, %v771_v36 }
 0x28e   : > { %1736 = vpow2.f32 %v806_v59  ;;  %v832_v16 = vmul.f32 1.442695, %v802_v5  ;;  %v798_v18 = vsub.f32 %v2190_v30, %v751_v60  ;;  %v755_v29 = vrot.slane %v705_v35, %v2303_v1 }
 0x28f   : > { %1738 = vpow2.f32 %v828_v62  ;;  %v808_v19 = vmul.f32 1.442695, %v790_v39  ;;  %v834_v21 = vmul.f32 1.442695, %v803_v14  ;;  %v791_v30 = vsub.f32 %v2192_v31, %v723_v17 }
 0x290   : > { %1740 = vpow2.f32 %v820_v51  ;;  %v824_v15 = vmul.f32 1.442695, %v798_v18  ;;  %v799_v24 = vsub.f32 %v2194_v33, %v755_v29  ;;  %v731_v45 = vrot.slane %v2270_v28, %v2280_v43 }
 0x291   : > { %1742 = vpow2.f32 %v830_v9  ;;  %v810_v35 = vmul.f32 1.442695, %v791_v30  ;;  %v792_v46 = vsub.f32 %v2225_v49, %v727_v25  ;;  %v735_v48 = vrot.slane %v2270_v28, %v2287_v50 }
 0x292   : > { %1744 = vpow2.f32 %v822_v13  ;;  %v826_v41 = vmul.f32 1.442695, %v799_v24  ;;  %v793_v52 = vsub.f32 %v2238_v58, %v731_v45  ;;  %v739_v49 = vrot.slane %v2270_v28, %v2296_v61 }
 0x293   : > { %1746 = vpow2.f32 %v832_v16  ;;  %v812_v53 = vmul.f32 1.442695, %v792_v46  ;;  %v794_v57 = vsub.f32 %v2213_v42, %v735_v48 }
 0x294   : > { %1748 = vpow2.f32 %v808_v19  ;;  %v814_v59 = vmul.f32 1.442695, %v793_v52  ;;  %v795_v58 = vsub.f32 %v2250_v12, %v739_v49 }
 0x295   : > { %1750 = vpow2.f32 %v834_v21  ;;  %v816_v37 = vmul.f32 1.442695, %v794_v57 }
 0x296   : > { %1752 = vpow2.f32 %v824_v15  ;;  %v818_v63 = vmul.f32 1.442695, %v795_v58 }
 0x297   : > { %v2312_v20 = vpop.eup %1734  ;;  %1754 = vpow2.f32 %v810_v35 }
 0x298   : > { %v2314_v44 = vpop.eup %1736  ;;  %853 = vperm.xlu0 %1706, %v2312_v20   ;;  %1756 = vpow2.f32 %v826_v41 }
 0x299   : > { %856 = vperm.xlu1 %1707, %v2314_v44   ;;  %v2320_v22 = vpop.eup %1738  ;;  %1758 = vpow2.f32 %v812_v53 }
 0x29a   : > { %v2322_v23 = vpop.eup %1740  ;;  %1760 = vpow2.f32 %v814_v59 }
 0x29b   : > { %v2329_v40 = vpop.eup %1742  ;;  %1762 = vpow2.f32 %v816_v37 }
 0x29c   : > { %889 = vperm.xlu0 %1706, %v2320_v22   ;;  %v2331_v31 = vpop.eup %1744  ;;  %1764 = vpow2.f32 %v818_v63 }
 0x29d   : > { %877 = vperm.xlu1 %1707, %v2322_v23   ;;  %v2338_v33 = vpop.eup %1746 }
 0x29e   : > { %v2340_v47 = vpop.eup %1748 }
 0x29f   : > { %v2347_v54 = vpop.eup %1750 }
 0x2a0   : > { %892 = vperm.xlu0 %1706, %v2329_v40   ;;  %v2349_v56 = vpop.eup %1752 }
 0x2a1   : > { %880 = vperm.xlu1 %1707, %v2331_v31   ;;  %v2356_v34 = vpop.eup %1754 }
 0x2a2   : > { %v2360_v62 = vpop.eup %1756 }
 0x2a3   : > { %v2363_v51 = vpop.eup %1758 }
 0x2a4   : > { %895 = vperm.xlu0 %1706, %v2338_v33   ;;  %v2366_v42 = vpop.eup %1760 }
 0x2a5   : > { %859 = vperm.xlu1 %1707, %v2340_v47   ;;  %v2369_v28 = vpop.eup %1762 }
 0x2a6   : > { %v2372_v12 = vpop.eup %1764 }
 0x2a8   : > { %898 = vperm.xlu0 %1706, %v2347_v54  }
 0x2a9   : > { %883 = vperm.xlu1 %1707, %v2349_v56  }
 0x2ad   : > { %862 = vperm.xlu1 %1707, %v2356_v34  }
 0x2b1   : > { %886 = vperm.xlu1 %1707, %v2360_v62  }
 0x2b5   : > { %865 = vperm.xlu1 %1707, %v2363_v51  }
 0x2b9   : > { %868 = vperm.xlu1 %1707, %v2366_v42  }
 0x2bd   : > { %871 = vperm.xlu1 %1707, %v2369_v28  }
 0x2c1   : > { %874 = vperm.xlu1 %1707, %v2372_v12  }
 0x317   : > { %v854_v36 = vpop.permute.xlu0 %853 }
 0x318   : > { %v857_v0 = vpop.permute.xlu1 %856 }
 0x319   : > { %v907_v63 = vrot.slane %v857_v0, %v2205_v38 }
 0x31b   : > { %v890_v9 = vpop.permute.xlu0 %889 }
 0x31c   : > { %v878_v5 = vpop.permute.xlu1 %877  ;;  %v951_v24 = vrot.slane %v890_v9, %v2205_v38 }
 0x31d   : > { %v935_v21 = vrot.slane %v878_v5, %v2205_v38  ;;  %v903_v5 = vrot.slane %v854_v36, %v2205_v38 }
 0x31f   : > { %v893_v39 = vpop.permute.xlu0 %892 }
 0x320   : > { %v881_v60 = vpop.permute.xlu1 %880  ;;  %v955_v41 = vrot.slane %v893_v39, %v2205_v38 }
 0x321   : > { %v939_v17 = vrot.slane %v881_v60, %v2205_v38 }
 0x323   : > { %v896_v16 = vpop.permute.xlu0 %895  ;;  %v971_v15 = vsel %vm676_vm1, %v939_v17, %v935_v21 }
 0x324   : > { %v860_v13 = vpop.permute.xlu1 %859  ;;  %v959_v46 = vrot.slane %v896_v16, %v2205_v38  ;;  %v964_v16 = vsel %vm676_vm1, %v907_v63, %v903_v5 }
 0x325   : > { %v911_v9 = vrot.slane %v860_v13, %v2205_v38 }
 0x327   : > { %v899_v35 = vpop.permute.xlu0 %898 }
 0x328   : > { %v884_v14 = vpop.permute.xlu1 %883  ;;  %v963_v53 = vrot.slane %v899_v35, %v2205_v38 }
 0x329   : > { %v943_v19 = vrot.slane %v884_v14, %v2205_v38 }
 0x32b   : > { %v972_v25 = vsel %vm678_vm2, %v943_v19, %v971_v15  ;;  %v965_v19 = vsel %vm678_vm2, %v911_v9, %v964_v16 }
 0x32c   : > { %v863_v18 = vpop.permute.xlu1 %862 }
 0x32d   : > { %v915_v60 = vrot.slane %v863_v18, %v2205_v38 }
 0x32f   : > { %v966_v0 = vsel %vm680_vm3, %v915_v60, %v965_v19 }
 0x330   : > { %v887_v29 = vpop.permute.xlu1 %886 }
 0x331   : > { %v947_v30 = vrot.slane %v887_v29, %v2205_v38 }
 0x333   : > { %v973_v45 = vsel %vm680_vm3, %v947_v30, %v972_v25 }
 0x334   : > { %v974_v48 = vsel %vm682_vm4, %v951_v24, %v973_v45  ;;  %v866_v52 = vpop.permute.xlu1 %865 }
 0x335   : > { %v975_v49 = vsel %vm684_vm5, %v955_v41, %v974_v48  ;;  %v919_v39 = vrot.slane %v866_v52, %v2205_v38 }
 0x336   : > { %v976_v57 = vsel %vm686_vm6, %v959_v46, %v975_v49 }
 0x337   : > { %v977_v59 = vsel %vm688_vm7, %v963_v53, %v976_v57  ;;  %v967_v36 = vsel %vm682_vm4, %v919_v39, %v966_v0 }
 0x338   : > { %v869_v58 = vpop.permute.xlu1 %868  ;;  %v983_v37 = vsel %vm699_vm8, %v977_v59, 0.0 }
 0x339   : > { %984 = vadd.xlane.f32.xlu0 %v983_v37  ;;  %v923_v17 = vrot.slane %v869_v58, %v2205_v38 }
 0x33b   : > { %v968_v13 = vsel %vm684_vm5, %v923_v17, %v967_v36 }
 0x33c   : > { %v872_v14 = vpop.permute.xlu1 %871 }
 0x33d   : > { %v927_v21 = vrot.slane %v872_v14, %v2205_v38 }
 0x33f   : > { %v969_v15 = vsel %vm686_vm6, %v927_v21, %v968_v13 }
 0x340   : > { %v875_v29 = vpop.permute.xlu1 %874 }
 0x341   : > { %v931_v18 = vrot.slane %v875_v29, %v2205_v38 }
 0x343   : > { %v970_v30 = vsel %vm688_vm7, %v931_v18, %v969_v15 }
 0x344   : > { %v980_v24 = vsel %vm699_vm8, %v970_v30, 0.0 }
 0x345   : > { %981 = vadd.xlane.f32.xlu1 %v980_v24 }
 0x3c6   : > { %v985_v25 = vpop.xlane.xlu0 %984 }
 0x3c7   : > { %1766 = vrcp.f32 %v985_v25 }
 0x3d1   : > { %v1767_v41 = vpop.eup %1766 }
 0x3d2   : > { %v982_v35 = vpop.xlane.xlu1 %981  ;;  %v1029_v46 = vrot.slane %v1767_v41, %v2268_v27  ;;  %v1025_v38 = vrot.slane %v1767_v41, %v2265_v26  ;;  %v1033_v59 = vrot.slane %v1767_v41, %v2291_v55 }
 0x3d3   : > { %1768 = vrcp.f32 %v982_v35 }
 0x3d4   : > { %v1079_v57 = vmul.f32 %v2331_v31, %v1029_v46  ;;  %v1078_v63 = vmul.f32 %v2322_v23, %v1025_v38  ;;  %v1041_v23 = vrot.slane %v1767_v41, %v2273_v32 }
 0x3d6   : > { %v1095_v9 = vpack.c.bf16 %v1079_v57, %v1079_v57  ;;  %v1082_v16 = vmul.f32 %v2320_v22, %v1041_v23 }
 0x3d8   : > { %v1098_v0 = vpack.c.bf16 %v1082_v16, %v1082_v16 }
 0x3dd   : > { %v1769_v45 = vpop.eup %1768 }
 0x3de   : > { %v997_v48 = vrot.slane %v1769_v45, %v2268_v27  ;;  %v993_v52 = vrot.slane %v1769_v45, %v2265_v26  ;;  %v1001_v5 = vrot.slane %v1769_v45, %v2291_v55  ;;  %v1080_v27 = vmul.f32 %v2349_v56, %v1033_v59 }
 0x3df   : > { %v1037_v26 = vrot.slane %v1767_v41, %v2303_v1  ;;  %v1005_v31 = vrot.slane %v1769_v45, %v2303_v1  ;;  %v1009_v56 = vrot.slane %v1769_v45, %v2273_v32  ;;  %v1017_v22 = vrot.slane %v1769_v45, %v2287_v50 }
 0x3e0   : > { %v1071_v53 = vmul.f32 %v2314_v44, %v997_v48  ;;  %v1070_v49 = vmul.f32 %v2312_v20, %v993_v52  ;;  %v1094_v44 = vpack.c.bf16 %v1078_v63, %v1078_v63  ;;  %v1072_v20 = vmul.f32 %v2340_v47, %v1001_v5 }
 0x3e1   : > { %v1081_v60 = vmul.f32 %v2360_v62, %v1037_v26  ;;  %v1096_v39 = vpack.c.bf16 %v1080_v27, %v1080_v27  ;;  %v1073_v14 = vmul.f32 %v2356_v34, %v1005_v31  ;;  %v1045_v47 = vrot.slane %v1767_v41, %v2280_v43 }
 0x3e2   : > { %v1087_v58 = vpack.c.bf16 %v1071_v53, %v1071_v53  ;;  %v1086_v37 = vpack.c.bf16 %v1070_v49, %v1070_v49  ;;  %v1088_v55 = vpack.c.bf16 %v1072_v20, %v1072_v20  ;;  %v1074_v19 = vmul.f32 %v2363_v51, %v1009_v56 }
 0x3e3   : > { %v1097_v17 = vpack.c.bf16 %v1081_v60, %v1081_v60  ;;  %v1089_v1 = vpack.c.bf16 %v1073_v14, %v1073_v14  ;;  %v1013_v62 = vrot.slane %v1769_v45, %v2280_v43  ;;  %v1083_v21 = vmul.f32 %v2329_v40, %v1045_v47 }
 0x3e4   : > { %1109 = vperm.xlu1 %1707, %v1087_v58   ;;  %1104 = vperm.xlu0 %1706, %v1086_v37   ;;  %v1049_v34 = vrot.slane %v1767_v41, %v2287_v50  ;;  %v1090_v32 = vpack.c.bf16 %v1074_v19, %v1074_v19  ;;  %v1053_v51 = vrot.slane %v1767_v41, %v2296_v61 }
 0x3e5   : > { %v1075_v36 = vmul.f32 %v2366_v42, %v1013_v62  ;;  %v1099_v13 = vpack.c.bf16 %v1083_v21, %v1083_v21  ;;  %v1076_v18 = vmul.f32 %v2369_v28, %v1017_v22  ;;  %v1021_v40 = vrot.slane %v1769_v45, %v2296_v61 }
 0x3e6   : > { %v1084_v29 = vmul.f32 %v2338_v33, %v1049_v34  ;;  %v1085_v42 = vmul.f32 %v2347_v54, %v1053_v51 }
 0x3e7   : > { %v1091_v43 = vpack.c.bf16 %v1075_v36, %v1075_v36  ;;  %v1092_v30 = vpack.c.bf16 %v1076_v18, %v1076_v18  ;;  %v1077_v50 = vmul.f32 %v2372_v12, %v1021_v40 }
 0x3e8   : > { %1149 = vperm.xlu0 %1706, %v1095_v9   ;;  %1144 = vperm.xlu1 %1707, %v1094_v44   ;;  %v1100_v15 = vpack.c.bf16 %v1084_v29, %v1084_v29  ;;  %v1101_v24 = vpack.c.bf16 %v1085_v42, %v1085_v42 }
 0x3e9   : > { %v1093_v33 = vpack.c.bf16 %v1077_v50, %v1077_v50 }
 0x3ec   : > { %1154 = vperm.xlu0 %1706, %v1096_v39   ;;  %1114 = vperm.xlu1 %1707, %v1088_v55  }
 0x3f0   : > { %1159 = vperm.xlu0 %1706, %v1097_v17   ;;  %1119 = vperm.xlu1 %1707, %v1089_v1  }
 0x3f4   : > { %1164 = vperm.xlu0 %1706, %v1098_v0   ;;  %1124 = vperm.xlu1 %1707, %v1090_v32  }
 0x3f8   : > { %1169 = vperm.xlu0 %1706, %v1099_v13   ;;  %1129 = vperm.xlu1 %1707, %v1091_v43  }
 0x3fc   : > { %1174 = vperm.xlu0 %1706, %v1100_v15   ;;  %1134 = vperm.xlu1 %1707, %v1092_v30  }
 0x400   : > { %1179 = vperm.xlu0 %1706, %v1101_v24   ;;  %1139 = vperm.xlu1 %1707, %v1093_v33   ;;  %v1770_v24 = vld [vmem:[%s2090_s6 + $0x10] sm:$0xf] }
 0x463   : > { %v1110_v25 = vpop.permute.xlu1 %1109  ;;  %v1105_v35 = vpop.permute.xlu0 %1104 }
 0x464   : > { %v1183_v28 = vmul.bf16 %v1110_v25, %v2104_v3  ;;  %v1182_v61 = vmul.bf16 %v1105_v35, %v2101_v2 }
 0x466   : > { %v1199_v41 = vunpack.c.l.bf16 %v1183_v28  ;;  %v1198_v45 = vunpack.c.l.bf16 %v1182_v61 }
 0x467   : > { %v1145_v46 = vpop.permute.xlu1 %1144  ;;  %v1150_v48 = vpop.permute.xlu0 %1149 }
 0x468   : > { %v1221_v54 = vsel %vm313_vm0, %v1199_v41, 0.0  ;;  %v1214_v12 = vsel %vm313_vm0, %v1198_v45, 0.0  ;;  %v1190_v52 = vmul.bf16 %v1145_v46, %v2107_v4  ;;  %v1191_v38 = vmul.bf16 %v1150_v48, %v2112_v6  ;;  %v1771_v48 = vld [vmem:[%s2090_s6 + $0x30] sm:$0xf] }
 0x469   : > { %v1222_v53 = vrot.slane %v1221_v54, 4  ;;  %v1215_v49 = vrot.slane %v1214_v12, 4 }
 0x46a   : > { %v1206_v57 = vunpack.c.l.bf16 %v1190_v52  ;;  %v1207_v59 = vunpack.c.l.bf16 %v1191_v38 }
 0x46b   : > { %v1223_v58 = vadd.f32 %v1222_v53, %v1221_v54  ;;  %v1216_v3 = vadd.f32 %v1215_v49, %v1214_v12  ;;  %v1115_v37 = vpop.permute.xlu1 %1114  ;;  %v1155_v2 = vpop.permute.xlu0 %1154 }
 0x46c   : > { %v1270_v63 = vsel %vm313_vm0, %v1206_v57, 0.0  ;;  %v1277_v5 = vsel %vm313_vm0, %v1207_v59, 0.0  ;;  %v1184_v27 = vmul.bf16 %v1115_v37, %v2115_v7  ;;  %v1192_v26 = vmul.bf16 %v1155_v2, %v2123_v10  ;;  %v1772_v59 = vld [vmem:[%s2090_s6 + $0x14] sm:$0xf] }
 0x46d   : > { %v1224_v9 = vrot.slane %v1223_v58, 2  ;;  %v1217_v4 = vrot.slane %v1216_v3, 2  ;;  %v1271_v44 = vrot.slane %v1270_v63, 4  ;;  %v1278_v6 = vrot.slane %v1277_v5, 4 }
 0x46e   : > { %v1200_v20 = vunpack.c.l.bf16 %v1184_v27  ;;  %v1208_v31 = vunpack.c.l.bf16 %v1192_v26 }
 0x46f   : > { %v1225_v60 = vadd.f32 %v1224_v9, %v1223_v58  ;;  %v1218_v23 = vadd.f32 %v1217_v4, %v1216_v3  ;;  %v1272_v39 = vadd.f32 %v1271_v44, %v1270_v63  ;;  %v1279_v55 = vadd.f32 %v1278_v6, %v1277_v5  ;;  %v1120_v14 = vpop.permute.xlu1 %1119  ;;  %v1160_v56 = vpop.permute.xlu0 %1159  ;;  %v1773_v9 = vld [vmem:[%s2090_s6 + $0x34] sm:$0xf] }
 0x470   : > { %v1228_v16 = vsel %vm313_vm0, %v1200_v20, 0.0  ;;  %v1284_v47 = vsel %vm313_vm0, %v1208_v31, 0.0  ;;  %v1185_v7 = vmul.bf16 %v1120_v14, %v2118_v8  ;;  %v1193_v10 = vmul.bf16 %v1160_v56, %v2126_v11 }
 0x471   : > { %v1226_v17 = vrot.slane %v1225_v60, 1  ;;  %v1219_v1 = vrot.slane %v1218_v23, 1  ;;  %v1273_v19 = vrot.slane %v1272_v39, 2  ;;  %v1280_v62 = vrot.slane %v1279_v55, 2 }
 0x472   : > { %v1229_v21 = vrot.slane %v1228_v16, 4  ;;  %v1285_v34 = vrot.slane %v1284_v47, 4  ;;  %v1201_v0 = vunpack.c.l.bf16 %v1185_v7  ;;  %v1209_v32 = vunpack.c.l.bf16 %v1193_v10 }
 0x473   : > { %v1125_v36 = vpop.permute.xlu1 %1124  ;;  %v1165_v22 = vpop.permute.xlu0 %1164  ;;  %v1274_v29 = vadd.f32 %v1273_v19, %v1272_v39  ;;  %v1227_v51 = vadd.f32 %v1226_v17, %v1225_v60  ;;  %v1220_v8 = vadd.f32 %v1219_v1, %v1218_v23  ;;  %v1281_v18 = vadd.f32 %v1280_v62, %v1279_v55 }
 0x474   : > { %v1235_v13 = vsel %vm313_vm0, %v1201_v0, 0.0  ;;  %v1291_v43 = vsel %vm313_vm0, %v1209_v32, 0.0  ;;  %v1230_v11 = vadd.f32 %v1229_v21, %v1228_v16  ;;  %v1286_v40 = vadd.f32 %v1285_v34, %v1284_v47  ;;  %v1774_v0 = vld [vmem:[%s2090_s6 + $0x18] sm:$0xf] }
 0x475   : > { %v1275_v15 = vrot.slane %v1274_v29, 1  ;;  %v1236_v30 = vrot.slane %v1235_v13, 4  ;;  %v1292_v42 = vrot.slane %v1291_v43, 4  ;;  %v1594_v50 = vpack.c.bf16 %v1227_v51, %v1227_v51  ;;  %v1775_v51 = vld [vmem:[%s2090_s6 + $0x38] sm:$0xf] }
 0x476   : > { %v1186_v33 = vmul.bf16 %v1770_v24, %v1125_v36  ;;  %v1593_v28 = vpack.c.bf16 %v1220_v8, %v1220_v8  ;;  %v1282_v61 = vrot.slane %v1281_v18, 1  ;;  %v1231_v41 = vrot.slane %v1230_v11, 2 }
 0x477   : > { %v1130_v25 = vpop.permute.xlu1 %1129  ;;  %v1170_v35 = vpop.permute.xlu0 %1169  ;;  %v1287_v45 = vrot.slane %v1286_v40, 2  ;;  %v1194_v54 = vmul.bf16 %v1771_v48, %v1165_v22  ;;  %v1276_v12 = vadd.f32 %v1275_v15, %v1274_v29  ;;  %v1237_v52 = vadd.f32 %v1236_v30, %v1235_v13 }
 0x478   : > { %v1202_v46 = vunpack.c.l.bf16 %v1186_v33  ;;  %v1293_v38 = vadd.f32 %v1292_v42, %v1291_v43  ;;  %v1391_v53 = vunpack.c.l.b16 %v1594_v50  ;;  %v1187_v58 = vmul.bf16 %v1772_v59, %v1130_v25 }
 0x479   : > { %v1210_v57 = vunpack.c.l.bf16 %v1194_v54  ;;  %v1390_v3 = vunpack.c.l.b16 %v1593_v28  ;;  %v1283_v37 = vadd.f32 %v1282_v61, %v1281_v18  ;;  %v1232_v2 = vadd.f32 %v1231_v41, %v1230_v11  ;;  %v1777_v61 = vld [vmem:[%s2090_s6 + $0x3c] sm:$0xf] }
 0x47a   : > { %v1242_v49 = vsel %vm313_vm0, %v1202_v46, 0.0  ;;  %v2459_v63 = vadd.f32 %v1287_v45, %v1286_v40  ;;  %v1203_v26 = vunpack.c.l.bf16 %v1187_v58  ;;  %v1195_v4 = vmul.bf16 %v1773_v9, %v1170_v35  ;;  %v1776_v35 = vld [vmem:[%s2090_s6 + $0x1c] sm:$0xf] }
 0x47b   : > { %v1243_v5 = vrot.slane %v1242_v49, 4  ;;  %v1298_v27 = vsel %vm313_vm0, %v1210_v57, 0.0  ;;  %v1135_v44 = vpop.permute.xlu1 %1134  ;;  %v1175_v6 = vpop.permute.xlu0 %1174  ;;  %v1601_v20 = vpack.c.bf16 %v1276_v12, %v1276_v12  ;;  %v1238_v31 = vrot.slane %v1237_v52, 2 }
 0x47c   : > { %v1294_v60 = vrot.slane %v1293_v38, 2  ;;  %v1299_v39 = vrot.slane %v1298_v27, 4  ;;  %v1249_v55 = vsel %vm313_vm0, %v1203_v26, 0.0  ;;  %v1211_v14 = vunpack.c.l.bf16 %v1195_v4 }
 0x47d   : > { %v1244_v23 = vadd.f32 %v1243_v5, %v1242_v49  ;;  %v2465_v56 = vsel %vm676_vm1, %v1391_v53, %v1390_v3  ;;  %v1602_v16 = vpack.c.bf16 %v1283_v37, %v1283_v37  ;;  %v1233_v47 = vrot.slane %v1232_v2, 1 }
 0x47e   : > { %v1289_v7 = vrot.slane %v2459_v63, 1  ;;  %v1300_v17 = vadd.f32 %v1299_v39, %v1298_v27  ;;  %v1250_v1 = vrot.slane %v1249_v55, 4  ;;  %v1305_v19 = vsel %vm313_vm0, %v1211_v14, 0.0 }
 0x47f   : > { %v1245_v10 = vrot.slane %v1244_v23, 2  ;;  %v2469_v62 = vunpack.c.l.b16 %v1601_v20  ;;  %v1239_v21 = vadd.f32 %v1238_v31, %v1237_v52  ;;  %v1306_v34 = vrot.slane %v1305_v19, 4  ;;  %v1140_v43 = vpop.permute.xlu1 %1139  ;;  %v1180_v8 = vpop.permute.xlu0 %1179 }
 0x480   : > { %v1188_v32 = vmul.bf16 %v1774_v0, %v1135_v44  ;;  %v1295_v36 = vadd.f32 %v1294_v60, %v1293_v38  ;;  %v1301_v22 = vrot.slane %v1300_v17, 2  ;;  %v1251_v29 = vadd.f32 %v1250_v1, %v1249_v55 }
 0x481   : > { %v1196_v13 = vmul.bf16 %v1775_v51, %v1175_v6  ;;  %v2473_v18 = vunpack.c.l.b16 %v1602_v16  ;;  %v1234_v11 = vadd.f32 %v1233_v47, %v1232_v2  ;;  %v1307_v40 = vadd.f32 %v1306_v34, %v1305_v19 }
 0x482   : > { %v1204_v15 = vunpack.c.l.bf16 %v1188_v32  ;;  %v1246_v30 = vadd.f32 %v1245_v10, %v1244_v23  ;;  %v1302_v42 = vadd.f32 %v1301_v22, %v1300_v17  ;;  %v1252_v50 = vrot.slane %v1251_v29, 2 }
 0x483   : > { %v1212_v24 = vunpack.c.l.bf16 %v1196_v13  ;;  %v1308_v33 = vrot.slane %v1307_v40, 2  ;;  %v1189_v28 = vmul.bf16 %v1776_v35, %v1140_v43  ;;  %v1197_v41 = vmul.bf16 %v1777_v61, %v1180_v8 }
 0x484   : > { %v1256_v25 = vsel %vm313_vm0, %v1204_v15, 0.0  ;;  %v1240_v45 = vrot.slane %v1239_v21, 1  ;;  %v1296_v46 = vrot.slane %v1295_v36, 1  ;;  %v1253_v48 = vadd.f32 %v1252_v50, %v1251_v29 }
 0x485   : > { %v1257_v54 = vrot.slane %v1256_v25, 4  ;;  %v1309_v12 = vadd.f32 %v1308_v33, %v1307_v40  ;;  %v1312_v52 = vsel %vm313_vm0, %v1212_v24, 0.0  ;;  %v1205_v38 = vunpack.c.l.bf16 %v1189_v28 }
 0x486   : > { %v1213_v53 = vunpack.c.l.bf16 %v1197_v41  ;;  %v1247_v49 = vrot.slane %v1246_v30, 1  ;;  %v1303_v57 = vrot.slane %v1302_v42, 1  ;;  %v1254_v59 = vrot.slane %v1253_v48, 1 }
 0x487   : > { %v1258_v58 = vadd.f32 %v1257_v54, %v1256_v25  ;;  %v1310_v3 = vrot.slane %v1309_v12, 1  ;;  %v1313_v37 = vrot.slane %v1312_v52, 4  ;;  %v1263_v2 = vsel %vm313_vm0, %v1205_v38, 0.0 }
 0x488   : > { %v1319_v5 = vsel %vm313_vm0, %v1213_v53, 0.0  ;;  %v1595_v27 = vpack.c.bf16 %v1234_v11, %v1234_v11  ;;  %v1290_v26 = vadd.f32 %v1289_v7, %v2459_v63  ;;  %v1241_v9 = vadd.f32 %v1240_v45, %v1239_v21 }
 0x489   : > { %v1259_v4 = vrot.slane %v1258_v58, 2  ;;  %v1297_v44 = vadd.f32 %v1296_v46, %v1295_v36  ;;  %v1314_v6 = vadd.f32 %v1313_v37, %v1312_v52  ;;  %v1264_v20 = vrot.slane %v1263_v2, 4 }
 0x48a   : > { %v1320_v31 = vrot.slane %v1319_v5, 4  ;;  %v1248_v60 = vadd.f32 %v1247_v49, %v1246_v30  ;;  %v1304_v23 = vadd.f32 %v1303_v57, %v1302_v42  ;;  %v1255_v39 = vadd.f32 %v1254_v59, %v1253_v48 }
 0x48b   : > { %v1260_v55 = vadd.f32 %v1259_v4, %v1258_v58  ;;  %v1311_v14 = vadd.f32 %v1310_v3, %v1309_v12  ;;  %v1315_v16 = vrot.slane %v1314_v6, 2  ;;  %v1265_v47 = vadd.f32 %v1264_v20, %v1263_v2 }
 0x48c   : > { %v1321_v10 = vadd.f32 %v1320_v31, %v1319_v5  ;;  %v1392_v17 = vunpack.c.l.b16 %v1595_v27  ;;  %v1603_v1 = vpack.c.bf16 %v1290_v26, %v1290_v26  ;;  %v1596_v19 = vpack.c.bf16 %v1241_v9, %v1241_v9 }
 0x48d   : > { %v1261_v34 = vrot.slane %v1260_v55, 1  ;;  %v1604_v0 = vpack.c.bf16 %v1297_v44, %v1297_v44  ;;  %v1316_v63 = vadd.f32 %v1315_v16, %v1314_v6  ;;  %v1266_v7 = vrot.slane %v1265_v47, 2 }
 0x48e   : > { %v1322_v21 = vrot.slane %v1321_v10, 2  ;;  %v1597_v32 = vpack.c.bf16 %v1248_v60, %v1248_v60  ;;  %v1605_v36 = vpack.c.bf16 %v1304_v23, %v1304_v23  ;;  %v1598_v22 = vpack.c.bf16 %v1255_v39, %v1255_v39 }
 0x48f   : > { %v1262_v29 = vadd.f32 %v1261_v34, %v1260_v55  ;;  %v1606_v51 = vpack.c.bf16 %v1311_v14, %v1311_v14  ;;  %v1317_v13 = vrot.slane %v1316_v63, 1  ;;  %v1267_v43 = vadd.f32 %v1266_v7, %v1265_v47 }
 0x490   : > { %v1323_v8 = vadd.f32 %v1322_v21, %v1321_v10  ;;  %v1413_v11 = vsel %vm676_vm1, %v2473_v18, %v2469_v62  ;;  %v1400_v40 = vunpack.c.l.b16 %v1603_v1  ;;  %v1393_v15 = vunpack.c.l.b16 %v1596_v19 }
 0x491   : > { %v1599_v30 = vpack.c.bf16 %v1262_v29, %v1262_v29  ;;  %v1401_v42 = vunpack.c.l.b16 %v1604_v0  ;;  %v1318_v50 = vadd.f32 %v1317_v13, %v1316_v63  ;;  %v1268_v24 = vrot.slane %v1267_v43, 1 }
 0x492   : > { %v1324_v33 = vrot.slane %v1323_v8, 1  ;;  %v1407_v25 = vsel %vm678_vm2, %v1392_v17, %v2465_v56  ;;  %v1394_v35 = vunpack.c.l.b16 %v1597_v32  ;;  %v1402_v28 = vunpack.c.l.b16 %v1605_v36 }
 0x493   : > { %v1395_v61 = vunpack.c.l.b16 %v1598_v22  ;;  %v1403_v41 = vunpack.c.l.b16 %v1606_v51  ;;  %v1607_v45 = vpack.c.bf16 %v1318_v50, %v1318_v50  ;;  %v1269_v46 = vadd.f32 %v1268_v24, %v1267_v43 }
 0x494   : > { %v1325_v48 = vadd.f32 %v1324_v33, %v1323_v8  ;;  %v1414_v62 = vsel %vm678_vm2, %v1400_v40, %v1413_v11  ;;  %v1408_v18 = vsel %vm680_vm3, %v1393_v15, %v1407_v25  ;;  %v1396_v54 = vunpack.c.l.b16 %v1599_v30 }
 0x495   : > { %v1415_v12 = vsel %vm680_vm3, %v1401_v42, %v1414_v62  ;;  %v1404_v52 = vunpack.c.l.b16 %v1607_v45  ;;  %v1600_v38 = vpack.c.bf16 %v1269_v46, %v1269_v46  ;;  %v1409_v56 = vsel %vm682_vm4, %v1394_v35, %v1408_v18 }
 0x496   : > { %v1608_v53 = vpack.c.bf16 %v1325_v48, %v1325_v48  ;;  %v1416_v49 = vsel %vm682_vm4, %v1402_v28, %v1415_v12  ;;  %v1410_v57 = vsel %vm684_vm5, %v1395_v61, %v1409_v56 }
 0x497   : > { %v1417_v59 = vsel %vm684_vm5, %v1403_v41, %v1416_v49  ;;  %v1397_v58 = vunpack.c.l.b16 %v1600_v38  ;;  %v1411_v37 = vsel %vm686_vm6, %v1396_v54, %v1410_v57 }
 0x498   : > { %v1405_v3 = vunpack.c.l.b16 %v1608_v53  ;;  %v1418_v2 = vsel %vm686_vm6, %v1404_v52, %v1417_v59 }
 0x499   : > { %v1412_v5 = vsel %vm688_vm7, %v1397_v58, %v1411_v37 }
 0x49a   : > { %v1419_v27 = vsel %vm688_vm7, %v1405_v3, %v1418_v2  ;;  %v1420_v26 = vpack.c.b16 %v1412_v5, %v1412_v5 }
 0x49b   : > { %v1421_v9 = vpack.c.b16 %v1419_v27, %v1419_v27 }
 0x49c   : > { %1425 = vst.msk [vmem:[%s230_s29] sm:$0xf] %vm1424_vm9, %v1420_v26 }
 0x49d   : > { %1426 = vst.msk [vmem:[%s230_s29 + $0x4] sm:$0xf] %vm1424_vm9, %v1421_v9 }
 0x49e   : > { %1849 = shalt.err (!%p1846_p7)
}
 0x49f   : > { %s1850_s6 = scalar_lea.hbm %s2503_s26, 128  ;;  %s1854_s12 = scalar_lea.hbm %s2553_s4, 256 }
 0x4a0   : > { %p1851_p9 = scmp.ne.s32.totalorder %s2503_s26, %s1850_s6  ;;  %p1855_p5 = scmp.lt.u32.totalorder %s2503_s26, %s2553_s4 }
 0x4a1   : > { %p1856_p11 = scmp.lt.u32.totalorder %s1854_s12, %s1850_s6  ;;  %p1858_p4 = scmp.lt.u32.totalorder %s1850_s6, %s2503_s26 }
 0x4a2   : > { %p1852_p1 = pnand %p1851_p9, %p2035_p12 }
 0x4a3   : > { %p1857_p2 = por %p1856_p11, %p1855_p5 }
 0x4a4   : > { %p1853_p0 = pneg %p1852_p1 }
 0x4a5   : > { %p1859_p6 = por %p1858_p4, %p1857_p2 }
 0x4a7   : > { %p1860_p8 = pnand %p1859_p6, %p1853_p0 }
 0x4a9   : > { %1863 = shalt.err (!%p1860_p8)
}
 0x4aa   : > { %s1914_s28 = smov 64   ;;  %s1915_s29 = smov 4  }
 0x4ab   : > { %1650 = dma.vmem_to_hbm [thread:$0]  (%p2035_p12), %s2505_s10, 128, %s2503_s26, %s1428_s8, %s1914_s28, %s1914_s28, %s1915_s29  }
 0x4ac PF: > { %s1456_s19 = sand.u32 1, %s1894_s15   ;;  %p2568_p10 = scmp.ne.s32.totalorder %s2558_s22, 0 }
 0x4ad   : > { %p2569_p13 = scmp.ge.s32.totalorder %s1906_s18, 2  ;;  %s1457_s7 = scalar_lea.sflag [#allocation4], %s1456_s19 }
 0x4af   : > { %p1661_p3 = pnand %p2569_p13, %p2568_p10 }
 0x4b1   : > { %1889 = dma.done.wait (!%p1661_p3), %s1457_s7, 128  }
 0x4b2   : > { %1891 = vsyncadd (!%p1661_p3), %s1457_s7, 4294967168  ;;  %p18_p7 = scmp.ge.s32.totalorder %s1997_s27, 4   ;;  %s2570_s15 = smov %s1898_s16 }
 0x4b3   : > { %s2571_s16 = smov %s1902_s17  ;;  %s2572_s17 = smov %s2031_s24 }
 0x4b4   : > { %s2573_s18 = smov %s1997_s27  ;;  %20 = sbr.rel (!%p18_p7) target bundleno = 6 (0x6), region = 85 }
 0x4bb   :  { %1462 = vsyncpa [#allocation3], 1 }
 0x4bc   :  { %1464 = vsyncpa [#allocation3 + $0x1], 1 }
 0x4bd   :  { %1465 = vsyncpa [#allocation6], 1 }
 0x4be   :  { %1466 = vsyncpa [#allocation4], 1 }
 0x4bf   :  { %1468 = vsyncpa [#allocation4 + $0x1], 1 }

</bundles_post_ra>
